<compile_context>
chip_gen: v7x
topology: tpu7x:2x2x1
jax: 0.10.0
libtpu: 0.0.40
codegen_flags: <defaults>
</compile_context>

<pallas_src>
import jax
import jax.numpy as jnp
from jax.experimental import pallas as pl
from jax.experimental.pallas import tpu as pltpu


TM_MAX = 2048   # max rows per grid step; per-step VMEM stays < 1 MiB


def _round_up(a, b):
    return ((a + b - 1) // b) * b


# ---------------------------------------------------------------------------
# Pallas kernel: fused (im2col-matmul conv w/ folded BN scale) + bias + ReLU
# ---------------------------------------------------------------------------
def conv_bias_relu_kernel(p_ref, w_ref, b_ref, o_ref):
    # p_ref: (tm, K)  bf16 im2col patch tile (K = Cin*k*k, unpadded)
    # w_ref: (K,  C)  bf16 conv weights with BN scale folded in (resident)
    # b_ref: (1,  C)  f32  BN shift (resident)
    # o_ref: (tm, C)  bf16 output tile (C = c_out, unpadded)
    acc = jnp.dot(p_ref[...], w_ref[...], preferred_element_type=jnp.float32)
    o_ref[...] = jnp.maximum(acc + b_ref[...], 0.0).astype(o_ref.dtype)


def conv_bias_relu(patches, w, bias, *, tm):
    M, K = patches.shape
    Kw, C = w.shape
    assert K == Kw and bias.shape == (1, C)

    # Honest (unpadded) traffic hints for XLA's scheduler.
    flops = 2 * M * K * C
    bytes_accessed = (M * K * patches.dtype.itemsize        # patch read
                      + K * C * w.dtype.itemsize            # weights (once)
                      + C * 4                                # bias (once)
                      + M * C * 2)                           # bf16 writeback

    return pl.pallas_call(
        conv_bias_relu_kernel,
        out_shape=jax.ShapeDtypeStruct((M, C), jnp.bfloat16),
        grid_spec=pltpu.PrefetchScalarGridSpec(
            num_scalar_prefetch=0,
            grid=(pl.cdiv(M, tm),),                       # partial tail block OK
            in_specs=[
                pl.BlockSpec((tm, K), lambda i: (i, 0)),  # K full-dim (64)
                pl.BlockSpec((K, C), lambda i: (0, 0)),   # resident weights
                pl.BlockSpec((1, C), lambda i: (0, 0)),   # resident bias
            ],
            out_specs=pl.BlockSpec((tm, C), lambda i: (i, 0)),  # C full-dim (32)
        ),
        compiler_params=pltpu.CompilerParams(
            dimension_semantics=("parallel",),
            vmem_limit_bytes=32 * 1024 * 1024,
        ),
        cost_estimate=pl.CostEstimate(
            flops=flops, transcendentals=0, bytes_accessed=bytes_accessed),
    )(patches, w, bias)


# ---------------------------------------------------------------------------
# Synthetic backbone `forward_features` (conv stem, NCHW in)
# ---------------------------------------------------------------------------
def forward_features(x, params, *, channels_last=True):
    # x: [N, C_in, H, W] (NCHW, PyTorch convention)
    N, Cin, H, W = x.shape
    k = params["kernel"]                       # stride == kernel (patch embed)
    c_out = params["c_out"]
    Ho, Wo = H // k, W // k
    M = N * Ho * Wo
    K = Cin * k * k

    # im2col for a non-overlapping k x k / stride-k conv is one layout pass.
    # Cast to bf16 FIRST so the single unavoidable NCHW permutation moves half
    # the bytes.  No K pad, no M pad -- the kernel consumes (M, K) directly.
    p = (x.astype(jnp.bfloat16)
           .reshape(N, Cin, Ho, k, Wo, k)
           .transpose(0, 2, 4, 1, 3, 5)
           .reshape(M, K))

    # Aim for >=4 grid steps (keeps both v7x TensorCores busy via the
    # "parallel" grid axis); 16-row granule for bf16 sublane packing.
    tm = max(16, min(TM_MAX, _round_up(pl.cdiv(M, 4), 16)))

    out2d = conv_bias_relu(p, params["w_folded"], params["bias"], tm=tm)
    feat = out2d.reshape(N, Ho, Wo, c_out)     # NHWC, no slice needed
    if channels_last:
        return feat                            # no output transpose (default)
    return feat.transpose(0, 3, 1, 2)          # NCHW for strict PyTorch parity


# ---------------------------------------------------------------------------
# Mask nearest interpolation (matches F.interpolate(..., mode='nearest'))
# ---------------------------------------------------------------------------
def interpolate_mask_nearest(mask, size):
    # mask: [N, H, W] bool -> [N, Ho, Wo] bool
    N, H, W = mask.shape
    Ho, Wo = size
    if H % Ho == 0 and W % Wo == 0:
        # integral ratio: strided slice is bit-identical to floor(j * H / Ho)
        return mask[:, :: H // Ho, :: W // Wo]
    ih = (jnp.arange(Ho) * H // Ho).astype(jnp.int32)
    iw = (jnp.arange(Wo) * W // Wo).astype(jnp.int32)
    return mask[:, ih][:, :, iw]


# ---------------------------------------------------------------------------
# CustomBackbone.forward equivalent
# ---------------------------------------------------------------------------
def custom_backbone_forward(tensors, mask, params, *, channels_last=True):
    # tensors: [N, C_in, H, W]; mask: [N, H, W] bool (True = padded)
    inter_features = forward_features(tensors, params,
                                      channels_last=channels_last)
    # synthetic backbone emits a single 4-D feature level (the '0' branch of
    # the original; the 5-D multi-level branch would just add more dict keys)
    xs = {"0": inter_features}
    out = {}
    for name, x in xs.items():
        size = x.shape[1:3] if channels_last else x.shape[-2:]
        m = interpolate_mask_nearest(mask, size)
        out[name] = (x, m)   # NestedTensor(x, mask) equivalent
    return out


# ---------------------------------------------------------------------------
# Deterministic parameter init (synthetic stand-in for the timm backbone)
# ---------------------------------------------------------------------------
def init_params(key, c_in=4, c_out=32, kernel=4, eps=1e-5):
    kw, kbn = jax.random.split(key)
    K = c_in * kernel * kernel
    w = jax.random.normal(kw, (K, c_out), jnp.float32) * 0.05
    gamma = jnp.ones((c_out,), jnp.float32)
    beta = jnp.zeros((c_out,), jnp.float32)
    running_mean = 0.01 * jax.random.normal(kbn, (c_out,), jnp.float32)
    running_var = jnp.ones((c_out,), jnp.float32)
    scale = gamma / jnp.sqrt(running_var + eps)
    shift = beta - running_mean * scale

    # Fold BN scale into the conv weights (inference identity):
    #   relu((p @ w) * scale + shift) == relu(p @ (w * scale) + shift)
    w_folded = (w * scale[None, :]).astype(jnp.bfloat16)   # bf16 MXU operand
    bias = shift.reshape(1, c_out)                          # f32 shift
    return {
        "kernel": kernel,
        "c_in": c_in,
        "c_out": c_out,
        "w_folded": w_folded,   # (K, c_out) bf16, no padding
        "bias": bias,           # (1, c_out) f32, no padding
    }
    # TODO(synk): real module loads pretrained timm weights; synthetic init here.


if __name__ == "__main__":
    key = jax.random.PRNGKey(0)
    k_x, k_m, k_p = jax.random.split(key, 3)

    N, C_in, H, W = 2, 4, 16, 16
    C_out, KK = 32, 4
    x = jax.random.normal(k_x, (N, C_in, H, W), jnp.float32)
    # padding-style bool mask (True = padded)
    mask = jax.random.uniform(k_m, (N, H, W)) > 0.7

    params = init_params(k_p, c_in=C_in, c_out=C_out, kernel=KK)

    # Default (channels_last=True): NHWC features, no output transpose pass.
    out = custom_backbone_forward(x, mask, params)
    feat, out_mask = out["0"]
    jax.block_until_ready(feat)
    jax.block_until_ready(out_mask)

    Ho, Wo = H // KK, W // KK
    assert feat.shape == (N, Ho, Wo, C_out)
    assert feat.dtype == jnp.bfloat16
    assert out_mask.shape == (N, Ho, Wo)
    assert out_mask.dtype == jnp.bool_
    assert bool(jnp.all(jnp.isfinite(feat.astype(jnp.float32))))

    # Pure-JAX reference (same bf16 operands, f32 accumulation) -- loose tol.
    p_ref = (x.astype(jnp.bfloat16).astype(jnp.float32)
               .reshape(N, C_in, Ho, KK, Wo, KK)
               .transpose(0, 2, 4, 1, 3, 5)
               .reshape(N * Ho * Wo, C_in * KK * KK))
    ref2d = jnp.maximum(
        p_ref @ params["w_folded"].astype(jnp.float32) + params["bias"], 0.0)
    ref = ref2d.reshape(N, Ho, Wo, C_out)
    assert bool(jnp.allclose(feat.astype(jnp.float32), ref, rtol=0.05, atol=0.05))

    # NCHW-parity path still available (extra transpose pass, off by default).
    out_nchw = custom_backbone_forward(x, mask, params, channels_last=False)
    feat_nchw, mask_nchw = out_nchw["0"]
    jax.block_until_ready(feat_nchw)
    assert feat_nchw.shape == (N, C_out, Ho, Wo)
    assert bool(jnp.array_equal(feat_nchw, feat.transpose(0, 3, 1, 2)))
    assert bool(jnp.array_equal(mask_nchw, out_mask))

    print("KERNEL_OK")
</pallas_src>

<mosaic_0001>
module attributes {stable_mosaic.version = 11 : i64} {
  func.func @conv_bias_relu_kernel(%arg0: i32, %arg1: memref<16x64xbf16, #tpu.memory_space<vmem>>, %arg2: memref<64x32xbf16, #tpu.memory_space<vmem>>, %arg3: memref<1x32xf32, #tpu.memory_space<vmem>>, %arg4: memref<16x32xbf16, #tpu.memory_space<vmem>>) attributes {dimension_semantics = [#tpu.dimension_semantics<parallel>], iteration_bounds = array<i64: 2>, scalar_prefetch = 0 : i64, scratch_operands = 0 : i64, tpu.core_type = #tpu.core_type<tc>, window_params = [{transform_indices = @transform_0, window_bounds = array<i64: 16, 64>}, {pipeline_mode = #tpu.pipeline_mode<synchronous>, transform_indices = @transform_1, window_bounds = array<i64: 64, 32>}, {pipeline_mode = #tpu.pipeline_mode<synchronous>, transform_indices = @transform_2, window_bounds = array<i64: 1, 32>}, {transform_indices = @transform_3, window_bounds = array<i64: 16, 32>}]} {
    %c0 = arith.constant 0 : index
    %c0_0 = arith.constant 0 : index
    %0 = vector.load %arg1[%c0, %c0_0] : memref<16x64xbf16, #tpu.memory_space<vmem>>, vector<16x64xbf16>
    %c0_1 = arith.constant 0 : index
    %c0_2 = arith.constant 0 : index
    %1 = vector.load %arg2[%c0_1, %c0_2] : memref<64x32xbf16, #tpu.memory_space<vmem>>, vector<64x32xbf16>
    %cst = arith.constant dense<0.000000e+00> : vector<16x32xf32>
    %2 = tpu.matmul %0, %1, %cst {dimension_numbers = #tpu.dot_dimension_numbers<[1], [0], [0], [1], [0, 0, 1, 1], [], []>} : vector<16x64xbf16>, vector<64x32xbf16>, vector<16x32xf32> -> vector<16x32xf32>
    %c0_3 = arith.constant 0 : index
    %c0_4 = arith.constant 0 : index
    %3 = vector.load %arg3[%c0_3, %c0_4] : memref<1x32xf32, #tpu.memory_space<vmem>>, vector<1x32xf32>
    %4 = vector.broadcast %3 : vector<1x32xf32> to vector<16x32xf32>
    %5 = arith.addf %2, %4 : vector<16x32xf32>
    %cst_5 = arith.constant 0.000000e+00 : f32
    %6 = vector.broadcast %cst_5 : f32 to vector<16x32xf32>
    %7 = arith.maximumf %5, %6 : vector<16x32xf32>
    %8 = arith.truncf %7 : vector<16x32xf32> to vector<16x32xbf16>
    %c0_6 = arith.constant 0 : index
    %c0_7 = arith.constant 0 : index
    %9 = vector.load %arg4[%c0_6, %c0_7] : memref<16x32xbf16, #tpu.memory_space<vmem>>, vector<16x32xbf16>
    tpu.vector_store %arg4[%c0_6, %c0_7], %8 {strides = array<i32>} : memref<16x32xbf16, #tpu.memory_space<vmem>>, vector<16x32xbf16>,
    return
  }
  func.func @transform_0(%arg0: i32) -> (i32, i32) {
    %c0_i32 = arith.constant 0 : i32
    %c0_i32_0 = arith.constant 0 : i32
    return %arg0, %c0_i32 : i32, i32
  }
  func.func @transform_1(%arg0: i32) -> (i32, i32) {
    %c0_i32 = arith.constant 0 : i32
    %c0_i32_0 = arith.constant 0 : i32
    %c0_i32_1 = arith.constant 0 : i32
    return %c0_i32, %c0_i32_0 : i32, i32
  }
  func.func @transform_2(%arg0: i32) -> (i32, i32) {
    %c0_i32 = arith.constant 0 : i32
    %c0_i32_0 = arith.constant 0 : i32
    %c0_i32_1 = arith.constant 0 : i32
    return %c0_i32, %c0_i32_0 : i32, i32
  }
  func.func @transform_3(%arg0: i32) -> (i32, i32) {
    %c0_i32 = arith.constant 0 : i32
    %c0_i32_0 = arith.constant 0 : i32
    return %arg0, %c0_i32 : i32, i32
  }
}

</mosaic_0001>

<bundles_post_ra>
// kernel: tpu_custom_call.1
= control target key start
LH: loop header
LB: loop body
LE: loop exit
PB: predicated region body
PF: predicated region fallthrough
CT: control target
= control target key end

     0   :  { %8 = vsyncpa [#allocation3], 0  ;;  %s648_s0 = inlined_call_operand.vmem [shape: bf16[32,64], index: 0, kind: input, shape index: {}]   ;;  %s649_s1 = inlined_call_operand.vmem [shape: bf16[64,32], index: 1, kind: input, shape index: {}]   ;;  %s650_s2 = inlined_call_operand.vmem [shape: f32[1,32], index: 2, kind: input, shape index: {}]   ;;  %s651_s3 = inlined_call_operand.hbm [shape: bf16[32,32], index: 3, kind: output, shape index: {}]  }
   0x1   :  { %10 = vsyncpa [#allocation3 + $0x1], 0  ;;  %s531_s12 = smov 0   ;;  %s533_s13 = smov 0  }
   0x2   :  { %s535_s14 = smov 0   ;;  %s537_s15 = smov 0  }
   0x3 LB: > { %s552_s16 = sadd.s32 4294967295, %s504_s15   ;;  %s353_s17 = sadd.s32 4294967294, %s504_s15   ;;  %s504_s15 = sphi %s537_s15, %s657_s15   ;;  %s500_s14 = sphi %s535_s14, %s656_s14   ;;  %s496_s13 = sphi %s533_s13, %s655_s13   ;;  %s492_s12 = sphi %s531_s12, %s654_s12  }
   0x4   : > { %s556_s18 = sadd.s32 1, %s504_s15   ;;  %s91_s19 = sadd.s32 1, %s500_s14 }
   0x5   : > { %s88_s20 = ssub.s32 %s504_s15, %s556_s18  ;;  %p101_p0 = scmp.ne.s32.totalorder %s500_s14, %s496_s13 }
   0x6   : > { %p89_p1 = scmp.eq.s32.totalorder %s88_s20, 0  ;;  %p102_p2 = scmp.eq.s32.totalorder %s552_s16, 1 }
   0x7   : > { %p107_p3 = scmp.ne.s32.totalorder %s496_s13, %s492_s12  ;;  %p108_p4 = scmp.eq.s32.totalorder %s353_s17, 1 }
   0x8   : > { %s567_s21 = scalar_select %p89_p1, %s500_s14, %s91_s19  }
   0x9   : > { %p569_p5 = por %p102_p2, %p101_p0  ;;  %p573_p6 = por %p108_p4, %p107_p3 }
   0xa   : > { %p356_p7 = scmp.ge.s32.totalorder %s504_s15, 1  ;;  %p141_p8 = scmp.lt.s32.totalorder %s504_s15, 3 }
   0xc   : > { %p142_p9 = pnand %p356_p7, %p141_p8 }
   0xd   : > { %v437_v0 = vld [vmem:[%s649_s1] sm:$0xff] (!%p142_p9)   ;;  %v506_v1 = vmov (!%p142_p9), 0.0   ;;  %v438_v2 = vld [vmem:[%s649_s1 + $0x8] sm:$0xff] (!%p142_p9)   ;;  %vm507_vm0 = vmmov (!%p142_p9), 0   ;;  %s358_s28 = sshll.u32 (!%p142_p9), %s552_s16, 1  ;;  %v439_v3 = vld [vmem:[%s649_s1 + $0x10] sm:$0xff] (!%p142_p9)  }
   0xe   : > { %145 = sbr.rel (%p142_p9) target bundleno = 265 (0x109), region = 32  ;;  %382 = vmatprep.subr.bf16.mxu0 (!%p142_p9), %v506_v1  ;;  %390 = vmatprep.mubr.msk.bf16.mxu0 (!%p142_p9), %vm507_vm0, %v506_v1  ;;  %p166_p10 = scmp.lt.s32.totalorder (!%p142_p9), %s358_s28, 3  ;;  %v440_v4 = vld [vmem:[%s649_s1 + $0x18] sm:$0xff] (!%p142_p9)   ;;  %vm219_vm1 = vcmask (!%p142_p9), 523264   ;;  %v360_v6 = vld [vmem:[%s650_s2] ss:$0 sm:$0xff] (!%p142_p9) }
   0xf   : > { %383 = vmatpush3.bf16.msra.mxu0 (!%p142_p9), %v437_v0  ;;  %s162_s10 = sand.u32 (!%p142_p9), 1, %s496_s13   ;;  %s376_s25 = sshll.u32 (!%p142_p9), %s552_s16, 7  ;;  %vm274_vm2 = vcmask (!%p142_p9), 257024  }
  0x10   : > { %384 = vmatprep.subr.bf16.mxu0 (!%p142_p9), %v506_v1  ;;  %s357_s11 = sshll.u32 (!%p142_p9), %s162_s10, 3  ;;  %s607_s29 = scalar_lea.sflag (!%p142_p9), [#allocation3], %s162_s10 }
  0x11   : > { %s164_s20 = scalar_lea.vmem (!%p142_p9), [#allocation2], %s357_s11  ;;  %s508_s16 = smov (!%p142_p9), [#allocation2]  }
  0x12   : > { %s291_s24 = sshll.u32 (!%p142_p9), %s164_s20, 4  ;;  %s600_s24 = int_to_ptr.vmem [resolvable:$true] %s291_s24 }
  0x13   : > { %385 = vmatpush3.bf16.msra.mxu0 (!%p142_p9), %v438_v2  ;;  %s442_s30 = scalar_lea.vmem (!%p142_p9), %s600_s24, 128 }
  0x14   : > { %386 = vmatprep.subr.bf16.mxu0 (!%p142_p9), %v506_v1  ;;  %p443_p11 = scmp.ne.s32.totalorder (!%p142_p9), %s600_s24, %s442_s30 }
  0x15   : > { %s659_s28 = smov (!%p166_p10, %s358_s28), 3 }
  0x16   : > { %s359_s4 = sshll.u32 %s659_s28, 2  ;;  %s605_s28 = scalar_lea.hbm %s651_s3, %s376_s25 }
  0x17   : > { %s169_s7 = scalar_lea.vmem %s648_s0, %s359_s4  ;;  %387 = vmatpush3.bf16.msra.mxu0 %v439_v3  ;;  %p444_p12 = pnand %p443_p11, %p569_p5 }
  0x18   : > { %388 = vmatprep.subr.bf16.mxu0 %v506_v1  ;;  %v441_v5 = vld [vmem:[%s169_s7] sm:$0xff]   ;;  %s446_s4 = sshll.u32 %s508_s16, 4  ;;  %s447_s4 = int_to_ptr.vmem [resolvable:$false] %s446_s4 }
  0x19   : > { %p445_p13 = pneg %p444_p12  ;;  %s448_s5 = scalar_lea.vmem %s447_s4, 256 }
  0x1a   : > { %p449_p0 = scmp.lt.s32.totalorder %s600_s24, %s447_s4  ;;  %p450_p1 = scmp.lt.s32.totalorder %s448_s5, %s442_s30 }
  0x1b   : > { %389 = vmatpush3.bf16.msra.mxu0 %v440_v4 }
  0x1c   : > { %p451_p2 = por %p450_p1, %p449_p0 }
  0x1e   : > { %391 = vmatmul.mubr.msk.bf16.vlgmr.msra.gmra.mrb[0].mxu0 %vm219_vm1, %v441_v5  ;;  %p452_p3 = pnand %p451_p2, %p445_p13 }
  0xf1   : > { %v257_v7 = vpop.f32.mrb[0].mxu0 }
  0xf2   : > { %v258_v8 = vadd.f32 %v360_v6, %v257_v7  ;;  %v392_v9 = vpop.f32.mrb[1].mxu0 }
  0xf3   : > { %v260_v10 = vpop.f32.mrb[2].mxu0 }
  0xf4   : > { %v264_v11 = vmax.f32 %v258_v8, 0.0  ;;  %v261_v12 = vadd.f32 %v360_v6, %v260_v10  ;;  %v393_v13 = vpop.f32.mrb[3].mxu0 }
  0xf6   : > { %v374_v14 = vpack.c.bf16 %v264_v11, %v264_v11  ;;  %v265_v15 = vmax.f32 %v261_v12, 0.0 }
  0xf8   : > { %275 = vst.msk [vmem:[%s164_s20] sm:$0xf] %vm274_vm2, %v374_v14  ;;  %v375_v16 = vpack.c.bf16 %v265_v15, %v265_v15 }
  0xfa   : > { %276 = vst.msk [vmem:[%s164_s20 + $0x4] sm:$0xf] %vm274_vm2, %v375_v16 }
  0xfb   : > { %455 = shalt.err (!%p452_p3)
}
  0xfc   : > { %s456_s6 = scalar_lea.hbm %s605_s28, 128  ;;  %s460_s9 = scalar_lea.hbm %s651_s3, 256 }
  0xfd   : > { %p457_p4 = scmp.ne.s32.totalorder %s605_s28, %s456_s6  ;;  %p461_p9 = scmp.lt.u32.totalorder %s605_s28, %s651_s3 }
  0xfe   : > { %p462_p10 = scmp.lt.u32.totalorder %s460_s9, %s456_s6  ;;  %p464_p12 = scmp.lt.u32.totalorder %s456_s6, %s605_s28 }
  0xff   : > { %p458_p7 = pnand %p457_p4, %p569_p5 }
 0x100   : > { %p463_p11 = por %p462_p10, %p461_p9 }
 0x101   : > { %p459_p8 = pneg %p458_p7 }
 0x102   : > { %p465_p13 = por %p464_p12, %p463_p11 }
 0x104   : > { %p466_p0 = pnand %p465_p13, %p459_p8 }
 0x106   : > { %469 = shalt.err (!%p466_p0)
}
 0x107   : > { %s509_s17 = smov 64   ;;  %s510_s19 = smov 4  }
 0x108   : > { %394 = dma.vmem_to_hbm [thread:$0]  (%p569_p5), %s600_s24, 128, %s605_s28, %s607_s29, %s509_s17, %s509_s17, %s510_s19  }
 0x109 PF: > { %p400_p1 = scmp.ge.s32.totalorder %s504_s15, 2  ;;  %s306_s20 = sand.u32 1, %s492_s12  }
 0x10a   : > { %s307_s25 = scalar_lea.sflag [#allocation3], %s306_s20 }
 0x10b   : > { %p397_p2 = pnand %p400_p1, %p573_p6 }
 0x10d   : > { %487 = dma.done.wait (!%p397_p2), %s307_s25, 128  }
 0x10e   : > { %489 = vsyncadd (!%p397_p2), %s307_s25, 4294967168  ;;  %p13_p3 = scmp.ge.s32.totalorder %s556_s18, 4   ;;  %s654_s12 = smov %s496_s13 }
 0x10f   : > { %s655_s13 = smov %s500_s14  ;;  %s656_s14 = smov %s567_s21 }
 0x110   : > { %s657_s15 = smov %s556_s18  ;;  %15 = sbr.rel (!%p13_p3) target bundleno = 3 (0x3), region = 67 }
 0x117   :  { %312 = vsyncpa [#allocation3], 1 }
 0x118   :  { %314 = vsyncpa [#allocation3 + $0x1], 1 }

</bundles_post_ra>
